<compile_context>
chip_gen: v6e
topology: v6e:2x2x1
jax: 0.10.0
libtpu: 0.0.40
codegen_flags: <defaults>
</compile_context>

<pallas_src>
import functools

import jax
import jax.numpy as jnp
from jax.experimental import pallas as pl
from jax.experimental.pallas import tpu as pltpu

LANE = 128                         # vreg lane width / MXU column granularity
_VMEM_BUDGET = 40 * 1024 * 1024    # tile-sizing budget (safe on v7x 64 MiB/TC)
_VMEM_LIMIT = 48 * 1024 * 1024     # scoped VMEM limit handed to Mosaic


def _round_up(n, m):
    return ((n + m - 1) // m) * m


def _pad2d(a, rows, cols):
    r, c = a.shape
    return jnp.pad(a, ((0, rows - r), (0, cols - c)))


def mlp_kernel(x_ref, w1_ref, b1_ref, w2_ref, b2_ref, w3_ref, b3_ref, o_ref,
               *, out_valid):
    # fc1 + ReLU  (padded hidden lanes carry zero weights/bias -> stay 0)
    h = jnp.dot(x_ref[...], w1_ref[...], preferred_element_type=jnp.float32)
    h = jnp.maximum(h + b1_ref[...], 0.0)
    # fc2 + ReLU  (cast back to weight dtype so bf16 weights keep bf16 MXU path)
    h = jnp.dot(h.astype(w2_ref.dtype), w2_ref[...],
                preferred_element_type=jnp.float32)
    h = jnp.maximum(h + b2_ref[...], 0.0)
    # fc3
    logits = jnp.dot(h.astype(w3_ref.dtype), w3_ref[...],
                     preferred_element_type=jnp.float32)
    logits = logits + b3_ref[...]

    # Mask padded output lanes so softmax over the padded lane axis matches the
    # unpadded softmax exactly.  Statically skipped when out_f % 128 == 0.
    out_cols = logits.shape[1]
    if out_valid < out_cols:
        col = jax.lax.broadcasted_iota(jnp.int32, logits.shape, 1)
        logits = jnp.where(col < out_valid, logits, jnp.float32(-1e30))

    # Numerically stable softmax over the feature axis (f32 epilogue).
    m = jnp.max(logits, axis=1, keepdims=True)
    e = jnp.exp(logits - m)
    denom = jnp.sum(e, axis=1, keepdims=True)
    # EUP reciprocal -> divide runs off the VPU slot; error << 1e-3 tolerance.
    o_ref[...] = (e * pl.reciprocal(denom, approx=True)).astype(o_ref.dtype)


def mlp_forward(x, w1, b1, w2, b2, w3, b3, *, tile_b=1024,
                compute_dtype=jnp.float32):
    batch, in_f = x.shape
    hid_f = w1.shape[1]
    out_f = w3.shape[1]

    # Lane-dense (128-padded) hidden/output dims.  The input feature dim and
    # the batch dim are NOT padded: the x BlockSpec uses the full array extent
    # and the grid uses cdiv, so no extra HBM round-trip for activations.
    hid_p = _round_up(hid_f, LANE)
    out_p = _round_up(out_f, LANE)
    # TODO(synk): for MXU-bound sizes on v6e/v7x, pad hid_p/out_p to 256 to
    # fill the 2x256^2 systolic array.

    act_itemsize = jnp.dtype(compute_dtype).itemsize

    # --- VMEM-budgeted batch-tile selection -------------------------------
    # Conservative: assume double-buffered weights in case the single-buffer
    # request below is not honoured by this JAX version.
    w_vmem = 2 * ((in_f * hid_p + hid_p * hid_p + hid_p * out_p) * act_itemsize
                  + (2 * hid_p + out_p) * 4)
    per_row = 2 * (in_f * act_itemsize + out_p * 4) + 4 * hid_p * 4
    max_rows = max(8, ((_VMEM_BUDGET - w_vmem) // per_row) // 8 * 8)

    batch8 = _round_up(batch, 8)
    tb = min(tile_b, max_rows, batch8)
    tb = max(8, (tb // 8) * 8)
    # Keep >=2 grid steps on large batches so v7x's two TensorCores both work.
    if batch8 >= 1024 and pl.cdiv(batch8, tb) < 2:
        tb = max(8, _round_up((batch8 + 1) // 2, 8))

    grid = (pl.cdiv(batch, tb),)

    # --- operand preparation (weights padded once; x untouched apart from an
    # optional dtype cast) ---------------------------------------------------
    x_c = x.astype(compute_dtype)
    w1_p = _pad2d(w1, in_f, hid_p).astype(compute_dtype)
    w2_p = _pad2d(w2, hid_p, hid_p).astype(compute_dtype)
    w3_p = _pad2d(w3, hid_p, out_p).astype(compute_dtype)
    b1_p = _pad2d(b1, 1, hid_p)   # biases stay f32 (f32 epilogue, v5e-safe)
    b2_p = _pad2d(b2, 1, hid_p)
    b3_p = _pad2d(b3, 1, out_p)

    kernel = functools.partial(mlp_kernel, out_valid=out_f)

    flops = 2 * batch * (in_f * hid_f + hid_f * hid_f + hid_f * out_f)
    bytes_accessed = (batch * in_f * act_itemsize + batch * out_p * 4
                      + (in_f * hid_p + hid_p * hid_p + hid_p * out_p)
                      * act_itemsize + (2 * hid_p + out_p) * 4)
    cost = pl.CostEstimate(flops=int(flops),
                           transcendentals=int(batch * out_p),
                           bytes_accessed=int(bytes_accessed))

    def _weight_spec(shape, single_buffer):
        # Grid-invariant blocks: single-buffering halves their VMEM footprint.
        if single_buffer:
            return pl.BlockSpec(shape, lambda i: (0, 0),
                                pipeline_mode=pl.Buffered(1))
        return pl.BlockSpec(shape, lambda i: (0, 0))

    def _call(single_buffer_weights):
        ws = functools.partial(_weight_spec,
                               single_buffer=single_buffer_weights)
        grid_spec = pltpu.PrefetchScalarGridSpec(
            num_scalar_prefetch=0,
            grid=grid,
            in_specs=[
                # activations: stream one batch tile per grid step
                # (full, unpadded feature extent; ragged last tile is masked)
                pl.BlockSpec((tb, in_f), lambda i: (i, 0)),
                # weights / biases: VMEM-resident across the whole grid
                ws((in_f, hid_p)),
                ws((1, hid_p)),
                ws((hid_p, hid_p)),
                ws((1, hid_p)),
                ws((hid_p, out_p)),
                ws((1, out_p)),
            ],
            out_specs=pl.BlockSpec((tb, out_p), lambda i: (i, 0)),
        )
        return pl.pallas_call(
            kernel,
            out_shape=jax.ShapeDtypeStruct((batch, out_p), jnp.float32),
            grid_spec=grid_spec,
            compiler_params=pltpu.CompilerParams(
                dimension_semantics=("parallel",),   # shard batch tiles (v7x)
                vmem_limit_bytes=_VMEM_LIMIT,
            ),
            cost_estimate=cost,
        )(x_c, w1_p, b1_p, w2_p, b2_p, w3_p, b3_p)

    try:
        out = _call(True)
    except Exception:
        # Fallback: this JAX build rejected pipeline_mode on the weight specs;
        # rerun with default (double) buffering.
        out = _call(False)

    if out_f == out_p:
        return out
    return out[:, :out_f]   # tiny lane slice only when output_size % 128 != 0


def init_params(key, input_size, hidden_size, output_size):
    """Deterministic init (uniform, PyTorch-Linear-like). Weights are (in, out)."""
    keys = jax.random.split(key, 6)

    def lin(kw, kb, fan_in, fan_out):
        bound = 1.0 / jnp.sqrt(fan_in)
        w = jax.random.uniform(kw, (fan_in, fan_out), jnp.float32, -bound, bound)
        b = jax.random.uniform(kb, (1, fan_out), jnp.float32, -bound, bound)
        return w, b

    w1, b1 = lin(keys[0], keys[1], input_size, hidden_size)
    w2, b2 = lin(keys[2], keys[3], hidden_size, hidden_size)
    w3, b3 = lin(keys[4], keys[5], hidden_size, output_size)
    return w1, b1, w2, b2, w3, b3


if __name__ == "__main__":
    input_size, hidden_size, output_size = 32, 32, 16
    batch = 8

    key = jax.random.PRNGKey(0)
    k_x, k_p = jax.random.split(key)
    x = jax.random.normal(k_x, (batch, input_size), jnp.float32)
    params = init_params(k_p, input_size, hidden_size, output_size)

    out = mlp_forward(x, *params)
    jax.block_until_ready(out)

    # sanity check vs plain-JAX reference (tolerance covers EUP approx recip)
    w1, b1, w2, b2, w3, b3 = params
    h = jnp.maximum(x @ w1 + b1, 0.0)
    h = jnp.maximum(h @ w2 + b2, 0.0)
    ref = jax.nn.softmax(h @ w3 + b3, axis=1)
    assert out.shape == ref.shape, "shape mismatch vs reference"
    assert jnp.allclose(out, ref, atol=1e-3), "mismatch vs reference"

    print("KERNEL_OK")
</pallas_src>

<mosaic_0001>
module attributes {stable_mosaic.version = 11 : i64} {
  func.func @mlp_kernel(%arg0: i32, %arg1: memref<8x32xf32, #tpu.memory_space<vmem>>, %arg2: memref<32x128xf32, #tpu.memory_space<vmem>>, %arg3: memref<1x128xf32, #tpu.memory_space<vmem>>, %arg4: memref<128x128xf32, #tpu.memory_space<vmem>>, %arg5: memref<1x128xf32, #tpu.memory_space<vmem>>, %arg6: memref<128x128xf32, #tpu.memory_space<vmem>>, %arg7: memref<1x128xf32, #tpu.memory_space<vmem>>, %arg8: memref<8x128xf32, #tpu.memory_space<vmem>>) attributes {dimension_semantics = [#tpu.dimension_semantics<parallel>], iteration_bounds = array<i64: 1>, scalar_prefetch = 0 : i64, scratch_operands = 0 : i64, tpu.core_type = #tpu.core_type<tc>, window_params = [{transform_indices = @transform_0, window_bounds = array<i64: 8, 32>}, {pipeline_mode = #tpu.pipeline_mode<synchronous>, transform_indices = @transform_1, window_bounds = array<i64: 32, 128>}, {pipeline_mode = #tpu.pipeline_mode<synchronous>, transform_indices = @transform_2, window_bounds = array<i64: 1, 128>}, {pipeline_mode = #tpu.pipeline_mode<synchronous>, transform_indices = @transform_3, window_bounds = array<i64: 128, 128>}, {pipeline_mode = #tpu.pipeline_mode<synchronous>, transform_indices = @transform_4, window_bounds = array<i64: 1, 128>}, {pipeline_mode = #tpu.pipeline_mode<synchronous>, transform_indices = @transform_5, window_bounds = array<i64: 128, 128>}, {pipeline_mode = #tpu.pipeline_mode<synchronous>, transform_indices = @transform_6, window_bounds = array<i64: 1, 128>}, {transform_indices = @transform_7, window_bounds = array<i64: 8, 128>}]} {
    %c0 = arith.constant 0 : index
    %c0_0 = arith.constant 0 : index
    %0 = vector.load %arg1[%c0, %c0_0] : memref<8x32xf32, #tpu.memory_space<vmem>>, vector<8x32xf32>
    %c0_1 = arith.constant 0 : index
    %c0_2 = arith.constant 0 : index
    %1 = vector.load %arg2[%c0_1, %c0_2] : memref<32x128xf32, #tpu.memory_space<vmem>>, vector<32x128xf32>
    %cst = arith.constant dense<0.000000e+00> : vector<8x128xf32>
    %2 = tpu.matmul %0, %1, %cst {dimension_numbers = #tpu.dot_dimension_numbers<[1], [0], [0], [1], [0, 0, 1, 1], [], []>} : vector<8x32xf32>, vector<32x128xf32>, vector<8x128xf32> -> vector<8x128xf32>
    %c0_3 = arith.constant 0 : index
    %c0_4 = arith.constant 0 : index
    %3 = vector.load %arg3[%c0_3, %c0_4] : memref<1x128xf32, #tpu.memory_space<vmem>>, vector<1x128xf32>
    %4 = vector.broadcast %3 : vector<1x128xf32> to vector<8x128xf32>
    %5 = arith.addf %2, %4 : vector<8x128xf32>
    %cst_5 = arith.constant 0.000000e+00 : f32
    %6 = vector.broadcast %cst_5 : f32 to vector<8x128xf32>
    %7 = arith.maximumf %5, %6 : vector<8x128xf32>
    %c0_6 = arith.constant 0 : index
    %c0_7 = arith.constant 0 : index
    %8 = vector.load %arg4[%c0_6, %c0_7] : memref<128x128xf32, #tpu.memory_space<vmem>>, vector<128x128xf32>
    %cst_8 = arith.constant dense<0.000000e+00> : vector<8x128xf32>
    %9 = tpu.matmul %7, %8, %cst_8 {dimension_numbers = #tpu.dot_dimension_numbers<[1], [0], [0], [1], [0, 0, 1, 1], [], []>} : vector<8x128xf32>, vector<128x128xf32>, vector<8x128xf32> -> vector<8x128xf32>
    %c0_9 = arith.constant 0 : index
    %c0_10 = arith.constant 0 : index
    %10 = vector.load %arg5[%c0_9, %c0_10] : memref<1x128xf32, #tpu.memory_space<vmem>>, vector<1x128xf32>
    %11 = vector.broadcast %10 : vector<1x128xf32> to vector<8x128xf32>
    %12 = arith.addf %9, %11 : vector<8x128xf32>
    %cst_11 = arith.constant 0.000000e+00 : f32
    %13 = vector.broadcast %cst_11 : f32 to vector<8x128xf32>
    %14 = arith.maximumf %12, %13 : vector<8x128xf32>
    %c0_12 = arith.constant 0 : index
    %c0_13 = arith.constant 0 : index
    %15 = vector.load %arg6[%c0_12, %c0_13] : memref<128x128xf32, #tpu.memory_space<vmem>>, vector<128x128xf32>
    %cst_14 = arith.constant dense<0.000000e+00> : vector<8x128xf32>
    %16 = tpu.matmul %14, %15, %cst_14 {dimension_numbers = #tpu.dot_dimension_numbers<[1], [0], [0], [1], [0, 0, 1, 1], [], []>} : vector<8x128xf32>, vector<128x128xf32>, vector<8x128xf32> -> vector<8x128xf32>
    %c0_15 = arith.constant 0 : index
    %c0_16 = arith.constant 0 : index
    %17 = vector.load %arg7[%c0_15, %c0_16] : memref<1x128xf32, #tpu.memory_space<vmem>>, vector<1x128xf32>
    %18 = vector.broadcast %17 : vector<1x128xf32> to vector<8x128xf32>
    %19 = arith.addf %16, %18 : vector<8x128xf32>
    %20 = tpu.iota {dimensions = array<i32: 1>} : vector<8x128xi32>
    %c16_i32 = arith.constant 16 : i32
    %21 = vector.broadcast %c16_i32 : i32 to vector<8x128xi32>
    %22 = arith.cmpi slt, %20, %21 : vector<8x128xi32>
    %cst_17 = arith.constant -1.000000e+30 : f32
    %23 = vector.broadcast %cst_17 : f32 to vector<8x128xf32>
    %24 = arith.select %22, %19, %23 : vector<8x128xi1>, vector<8x128xf32>
    %cst_18 = arith.constant dense<0xFF800000> : vector<8xf32>
    %25 = vector.multi_reduction <maximumf>, %24, %cst_18 [1] : vector<8x128xf32> to vector<8xf32>
    %26 = vector.shape_cast %25 : vector<8xf32> to vector<8x1xf32>
    %27 = vector.broadcast %26 : vector<8x1xf32> to vector<8x128xf32>
    %28 = arith.subf %24, %27 : vector<8x128xf32>
    %29 = math.exp %28 : vector<8x128xf32>
    %cst_19 = arith.constant dense<0.000000e+00> : vector<8xf32>
    %30 = vector.multi_reduction <add>, %29, %cst_19 [1] : vector<8x128xf32> to vector<8xf32>
    %31 = vector.shape_cast %30 : vector<8xf32> to vector<8x1xf32>
    %32 = tpu.reciprocal %31 {approx = true} : vector<8x1xf32> -> vector<8x1xf32>
    %33 = vector.broadcast %32 : vector<8x1xf32> to vector<8x128xf32>
    %34 = arith.mulf %29, %33 : vector<8x128xf32>
    %c0_20 = arith.constant 0 : index
    %c0_21 = arith.constant 0 : index
    %35 = vector.load %arg8[%c0_20, %c0_21] : memref<8x128xf32, #tpu.memory_space<vmem>>, vector<8x128xf32>
    tpu.vector_store %arg8[%c0_20, %c0_21], %34 {strides = array<i32>} : memref<8x128xf32, #tpu.memory_space<vmem>>, vector<8x128xf32>,
    return
  }
  func.func @transform_0(%arg0: i32) -> (i32, i32) {
    %c0_i32 = arith.constant 0 : i32
    %c0_i32_0 = arith.constant 0 : i32
    return %arg0, %c0_i32 : i32, i32
  }
  func.func @transform_1(%arg0: i32) -> (i32, i32) {
    %c0_i32 = arith.constant 0 : i32
    %c0_i32_0 = arith.constant 0 : i32
    %c0_i32_1 = arith.constant 0 : i32
    return %c0_i32, %c0_i32_0 : i32, i32
  }
  func.func @transform_2(%arg0: i32) -> (i32, i32) {
    %c0_i32 = arith.constant 0 : i32
    %c0_i32_0 = arith.constant 0 : i32
    %c0_i32_1 = arith.constant 0 : i32
    return %c0_i32, %c0_i32_0 : i32, i32
  }
  func.func @transform_3(%arg0: i32) -> (i32, i32) {
    %c0_i32 = arith.constant 0 : i32
    %c0_i32_0 = arith.constant 0 : i32
    %c0_i32_1 = arith.constant 0 : i32
    return %c0_i32, %c0_i32_0 : i32, i32
  }
  func.func @transform_4(%arg0: i32) -> (i32, i32) {
    %c0_i32 = arith.constant 0 : i32
    %c0_i32_0 = arith.constant 0 : i32
    %c0_i32_1 = arith.constant 0 : i32
    return %c0_i32, %c0_i32_0 : i32, i32
  }
  func.func @transform_5(%arg0: i32) -> (i32, i32) {
    %c0_i32 = arith.constant 0 : i32
    %c0_i32_0 = arith.constant 0 : i32
    %c0_i32_1 = arith.constant 0 : i32
    return %c0_i32, %c0_i32_0 : i32, i32
  }
  func.func @transform_6(%arg0: i32) -> (i32, i32) {
    %c0_i32 = arith.constant 0 : i32
    %c0_i32_0 = arith.constant 0 : i32
    %c0_i32_1 = arith.constant 0 : i32
    return %c0_i32, %c0_i32_0 : i32, i32
  }
  func.func @transform_7(%arg0: i32) -> (i32, i32) {
    %c0_i32 = arith.constant 0 : i32
    %c0_i32_0 = arith.constant 0 : i32
    return %arg0, %c0_i32 : i32, i32
  }
}

module attributes {stable_mosaic.version = 11 : i64} {
  func.func @mlp_kernel(%arg0: i32, %arg1: memref<8x32xf32, #tpu.memory_space<vmem>>, %arg2: memref<32x128xf32, #tpu.memory_space<vmem>>, %arg3: memref<1x128xf32, #tpu.memory_space<vmem>>, %arg4: memref<128x128xf32, #tpu.memory_space<vmem>>, %arg5: memref<1x128xf32, #tpu.memory_space<vmem>>, %arg6: memref<128x128xf32, #tpu.memory_space<vmem>>, %arg7: memref<1x128xf32, #tpu.memory_space<vmem>>, %arg8: memref<8x128xf32, #tpu.memory_space<vmem>>) attributes {dimension_semantics = [#tpu.dimension_semantics<parallel>], iteration_bounds = array<i64: 1>, scalar_prefetch = 0 : i64, scratch_operands = 0 : i64, tpu.core_type = #tpu.core_type<tc>, window_params = [{transform_indices = @transform_0, window_bounds = array<i64: 8, 32>}, {pipeline_mode = #tpu.pipeline_mode<synchronous>, transform_indices = @transform_1, window_bounds = array<i64: 32, 128>}, {pipeline_mode = #tpu.pipeline_mode<synchronous>, transform_indices = @transform_2, window_bounds = array<i64: 1, 128>}, {pipeline_mode = #tpu.pipeline_mode<synchronous>, transform_indices = @transform_3, window_bounds = array<i64: 128, 128>}, {pipeline_mode = #tpu.pipeline_mode<synchronous>, transform_indices = @transform_4, window_bounds = array<i64: 1, 128>}, {pipeline_mode = #tpu.pipeline_mode<synchronous>, transform_indices = @transform_5, window_bounds = array<i64: 128, 128>}, {pipeline_mode = #tpu.pipeline_mode<synchronous>, transform_indices = @transform_6, window_bounds = array<i64: 1, 128>}, {transform_indices = @transform_7, window_bounds = array<i64: 8, 128>}]} {
    %c0 = arith.constant 0 : index
    %c0_0 = arith.constant 0 : index
    %0 = vector.load %arg1[%c0, %c0_0] : memref<8x32xf32, #tpu.memory_space<vmem>>, vector<8x32xf32>
    %c0_1 = arith.constant 0 : index
    %c0_2 = arith.constant 0 : index
    %1 = vector.load %arg2[%c0_1, %c0_2] : memref<32x128xf32, #tpu.memory_space<vmem>>, vector<32x128xf32>
    %cst = arith.constant dense<0.000000e+00> : vector<8x128xf32>
    %2 = tpu.matmul %0, %1, %cst {dimension_numbers = #tpu.dot_dimension_numbers<[1], [0], [0], [1], [0, 0, 1, 1], [], []>} : vector<8x32xf32>, vector<32x128xf32>, vector<8x128xf32> -> vector<8x128xf32>
    %c0_3 = arith.constant 0 : index
    %c0_4 = arith.constant 0 : index
    %3 = vector.load %arg3[%c0_3, %c0_4] : memref<1x128xf32, #tpu.memory_space<vmem>>, vector<1x128xf32>
    %4 = vector.broadcast %3 : vector<1x128xf32> to vector<8x128xf32>
    %5 = arith.addf %2, %4 : vector<8x128xf32>
    %cst_5 = arith.constant 0.000000e+00 : f32
    %6 = vector.broadcast %cst_5 : f32 to vector<8x128xf32>
    %7 = arith.maximumf %5, %6 : vector<8x128xf32>
    %c0_6 = arith.constant 0 : index
    %c0_7 = arith.constant 0 : index
    %8 = vector.load %arg4[%c0_6, %c0_7] : memref<128x128xf32, #tpu.memory_space<vmem>>, vector<128x128xf32>
    %cst_8 = arith.constant dense<0.000000e+00> : vector<8x128xf32>
    %9 = tpu.matmul %7, %8, %cst_8 {dimension_numbers = #tpu.dot_dimension_numbers<[1], [0], [0], [1], [0, 0, 1, 1], [], []>} : vector<8x128xf32>, vector<128x128xf32>, vector<8x128xf32> -> vector<8x128xf32>
    %c0_9 = arith.constant 0 : index
    %c0_10 = arith.constant 0 : index
    %10 = vector.load %arg5[%c0_9, %c0_10] : memref<1x128xf32, #tpu.memory_space<vmem>>, vector<1x128xf32>
    %11 = vector.broadcast %10 : vector<1x128xf32> to vector<8x128xf32>
    %12 = arith.addf %9, %11 : vector<8x128xf32>
    %cst_11 = arith.constant 0.000000e+00 : f32
    %13 = vector.broadcast %cst_11 : f32 to vector<8x128xf32>
    %14 = arith.maximumf %12, %13 : vector<8x128xf32>
    %c0_12 = arith.constant 0 : index
    %c0_13 = arith.constant 0 : index
    %15 = vector.load %arg6[%c0_12, %c0_13] : memref<128x128xf32, #tpu.memory_space<vmem>>, vector<128x128xf32>
    %cst_14 = arith.constant dense<0.000000e+00> : vector<8x128xf32>
    %16 = tpu.matmul %14, %15, %cst_14 {dimension_numbers = #tpu.dot_dimension_numbers<[1], [0], [0], [1], [0, 0, 1, 1], [], []>} : vector<8x128xf32>, vector<128x128xf32>, vector<8x128xf32> -> vector<8x128xf32>
    %c0_15 = arith.constant 0 : index
    %c0_16 = arith.constant 0 : index
    %17 = vector.load %arg7[%c0_15, %c0_16] : memref<1x128xf32, #tpu.memory_space<vmem>>, vector<1x128xf32>
    %18 = vector.broadcast %17 : vector<1x128xf32> to vector<8x128xf32>
    %19 = arith.addf %16, %18 : vector<8x128xf32>
    %20 = tpu.iota {dimensions = array<i32: 1>} : vector<8x128xi32>
    %c16_i32 = arith.constant 16 : i32
    %21 = vector.broadcast %c16_i32 : i32 to vector<8x128xi32>
    %22 = arith.cmpi slt, %20, %21 : vector<8x128xi32>
    %cst_17 = arith.constant -1.000000e+30 : f32
    %23 = vector.broadcast %cst_17 : f32 to vector<8x128xf32>
    %24 = arith.select %22, %19, %23 : vector<8x128xi1>, vector<8x128xf32>
    %cst_18 = arith.constant dense<0xFF800000> : vector<8xf32>
    %25 = vector.multi_reduction <maximumf>, %24, %cst_18 [1] : vector<8x128xf32> to vector<8xf32>
    %26 = vector.shape_cast %25 : vector<8xf32> to vector<8x1xf32>
    %27 = vector.broadcast %26 : vector<8x1xf32> to vector<8x128xf32>
    %28 = arith.subf %24, %27 : vector<8x128xf32>
    %29 = math.exp %28 : vector<8x128xf32>
    %cst_19 = arith.constant dense<0.000000e+00> : vector<8xf32>
    %30 = vector.multi_reduction <add>, %29, %cst_19 [1] : vector<8x128xf32> to vector<8xf32>
    %31 = vector.shape_cast %30 : vector<8xf32> to vector<8x1xf32>
    %32 = tpu.reciprocal %31 {approx = true} : vector<8x1xf32> -> vector<8x1xf32>
    %33 = vector.broadcast %32 : vector<8x1xf32> to vector<8x128xf32>
    %34 = arith.mulf %29, %33 : vector<8x128xf32>
    %c0_20 = arith.constant 0 : index
    %c0_21 = arith.constant 0 : index
    %35 = vector.load %arg8[%c0_20, %c0_21] : memref<8x128xf32, #tpu.memory_space<vmem>>, vector<8x128xf32>
    tpu.vector_store %arg8[%c0_20, %c0_21], %34 {strides = array<i32>} : memref<8x128xf32, #tpu.memory_space<vmem>>, vector<8x128xf32>,
    return
  }
  func.func @transform_0(%arg0: i32) -> (i32, i32) {
    %c0_i32 = arith.constant 0 : i32
    %c0_i32_0 = arith.constant 0 : i32
    return %arg0, %c0_i32 : i32, i32
  }
  func.func @transform_1(%arg0: i32) -> (i32, i32) {
    %c0_i32 = arith.constant 0 : i32
    %c0_i32_0 = arith.constant 0 : i32
    %c0_i32_1 = arith.constant 0 : i32
    return %c0_i32, %c0_i32_0 : i32, i32
  }
  func.func @transform_2(%arg0: i32) -> (i32, i32) {
    %c0_i32 = arith.constant 0 : i32
    %c0_i32_0 = arith.constant 0 : i32
    %c0_i32_1 = arith.constant 0 : i32
    return %c0_i32, %c0_i32_0 : i32, i32
  }
  func.func @transform_3(%arg0: i32) -> (i32, i32) {
    %c0_i32 = arith.constant 0 : i32
    %c0_i32_0 = arith.constant 0 : i32
    %c0_i32_1 = arith.constant 0 : i32
    return %c0_i32, %c0_i32_0 : i32, i32
  }
  func.func @transform_4(%arg0: i32) -> (i32, i32) {
    %c0_i32 = arith.constant 0 : i32
    %c0_i32_0 = arith.constant 0 : i32
    %c0_i32_1 = arith.constant 0 : i32
    return %c0_i32, %c0_i32_0 : i32, i32
  }
  func.func @transform_5(%arg0: i32) -> (i32, i32) {
    %c0_i32 = arith.constant 0 : i32
    %c0_i32_0 = arith.constant 0 : i32
    %c0_i32_1 = arith.constant 0 : i32
    return %c0_i32, %c0_i32_0 : i32, i32
  }
  func.func @transform_6(%arg0: i32) -> (i32, i32) {
    %c0_i32 = arith.constant 0 : i32
    %c0_i32_0 = arith.constant 0 : i32
    %c0_i32_1 = arith.constant 0 : i32
    return %c0_i32, %c0_i32_0 : i32, i32
  }
  func.func @transform_7(%arg0: i32) -> (i32, i32) {
    %c0_i32 = arith.constant 0 : i32
    %c0_i32_0 = arith.constant 0 : i32
    return %arg0, %c0_i32 : i32, i32
  }
}

</mosaic_0001>

<bundles_post_ra>
// kernel: tpu_custom_call.1
= control target key start
LH: loop header
LB: loop body
LE: loop exit
PB: predicated region body
PF: predicated region fallthrough
CT: control target
= control target key end

     0   :  { %12 = vsyncpa [#allocation3], 0  ;;  %s754_s0 = inlined_call_operand.hbm [shape: f32[8,32], index: 0, kind: input, shape index: {}]   ;;  %s755_s1 = inlined_call_operand.hbm [shape: f32[32,128], index: 1, kind: input, shape index: {}]   ;;  %s756_s2 = inlined_call_operand.vmem [shape: f32[1,128], index: 2, kind: input, shape index: {}]   ;;  %s757_s3 = inlined_call_operand.hbm [shape: f32[128,128], index: 3, kind: input, shape index: {}]   ;;  %s758_s4 = inlined_call_operand.vmem [shape: f32[1,128], index: 4, kind: input, shape index: {}]   ;;  %s759_s5 = inlined_call_operand.hbm [shape: f32[128,128], index: 5, kind: input, shape index: {}]   ;;  %s760_s6 = inlined_call_operand.vmem [shape: f32[1,128], index: 6, kind: input, shape index: {}]   ;;  %s761_s7 = inlined_call_operand.hbm [shape: f32[8,128], index: 7, kind: output, shape index: {}]  }
   0x1   :  { %13 = vsyncpa [#allocation6], 0 }
   0x2   :  { %14 = vsyncpa [#allocation9], 0 }
   0x3   :  { %15 = vsyncpa [#allocation4], 0  ;;  %s630_s24 = smov [#allocation5]  }
   0x4   :  { %s31_s25 = sshll.u32 %s630_s24, 4  ;;  %s32_s25 = int_to_ptr.vmem [resolvable:$true] %s31_s25 }
   0x5   :  { %s530_s26 = scalar_lea.vmem %s32_s25, 512  ;;  %p535_p1 = scmp.lt.s32.totalorder %s32_s25, %s32_s25 }
   0x6   :  { %p531_p0 = scmp.ne.s32.totalorder %s32_s25, %s530_s26  ;;  %p536_p2 = scmp.lt.s32.totalorder %s530_s26, %s530_s26 }
   0x8   :  { %p537_p3 = por %p536_p2, %p535_p1 }
   0xa   :  { %p538_p4 = pnand %p537_p3, %p531_p0 }
   0xc   :  { %541 = shalt.err (!%p538_p4)
}
   0xd   :  { %s631_s27 = smov 128   ;;  %s632_s28 = smov 8  }
   0xe   :  { %37 = dma.hbm_to_vmem [thread:$0]  %s755_s1, 512, %s32_s25, [#allocation6], %s631_s27, %s631_s27, %s632_s28  }
   0xf   :  { %s633_s8 = smov [#allocation2]   ;;  %s634_s10 = smov [#allocation7]  }
  0x10   :  { %s22_s9 = sshll.u32 %s633_s8, 4  ;;  %s45_s11 = sshll.u32 %s634_s10, 4  ;;  %s23_s9 = int_to_ptr.vmem [resolvable:$true] %s22_s9  ;;  %s46_s11 = int_to_ptr.vmem [resolvable:$true] %s45_s11 }
  0x11   :  { %s550_s12 = scalar_lea.vmem %s23_s9, 128  ;;  %p555_p6 = scmp.lt.s32.totalorder %s23_s9, %s23_s9 }
  0x12   :  { %p551_p5 = scmp.ne.s32.totalorder %s23_s9, %s550_s12  ;;  %p556_p7 = scmp.lt.s32.totalorder %s550_s12, %s550_s12 }
  0x14   :  { %p557_p8 = por %p556_p7, %p555_p6 }
  0x16   :  { %p558_p9 = pnand %p557_p8, %p551_p5 }
  0x18   :  { %561 = shalt.err (!%p558_p9)
}
  0x19   :  { %25 = dma.hbm_to_vmem [thread:$0]  %s754_s0, 128, %s23_s9, [#allocation3]  }
  0x1a   :  { %s570_s15 = scalar_lea.vmem %s46_s11, 2048  ;;  %p575_p11 = scmp.lt.s32.totalorder %s46_s11, %s46_s11 }
  0x1b   :  { %p571_p10 = scmp.ne.s32.totalorder %s46_s11, %s570_s15  ;;  %p576_p12 = scmp.lt.s32.totalorder %s570_s15, %s570_s15 }
  0x1d   :  { %p577_p13 = por %p576_p12, %p575_p11 }
  0x1f   :  { %p578_p0 = pnand %p577_p13, %p571_p10 }
  0x21   :  { %581 = shalt.err (!%p578_p0)
}
  0x22   :  { %51 = dma.hbm_to_vmem [thread:$0]  %s757_s3, 2048, %s46_s11, [#allocation6], %s631_s27, %s631_s27, %s632_s28  }
  0x23   :  { %s635_s17 = smov [#allocation8]  }
  0x24   :  { %s59_s18 = sshll.u32 %s635_s17, 4  ;;  %s60_s18 = int_to_ptr.vmem [resolvable:$true] %s59_s18 }
  0x25   :  { %s590_s19 = scalar_lea.vmem %s60_s18, 2048  ;;  %p595_p2 = scmp.lt.s32.totalorder %s60_s18, %s60_s18 }
  0x26   :  { %p591_p1 = scmp.ne.s32.totalorder %s60_s18, %s590_s19  ;;  %p596_p3 = scmp.lt.s32.totalorder %s590_s19, %s590_s19 }
  0x28   :  { %p597_p4 = por %p596_p3, %p595_p2 }
  0x2a   :  { %p598_p5 = pnand %p597_p4, %p591_p1 }
  0x2c   :  { %601 = shalt.err (!%p598_p5)
}
  0x2d   :  { %65 = dma.hbm_to_vmem [thread:$0]  %s759_s5, 2048, %s60_s18, [#allocation9], %s631_s27, %s631_s27, %s632_s28  }
  0x2e   :  { %622 = dma.done.wait [#allocation3], 128  }
  0x2f   :  { %623 = vsyncadd [#allocation3], 4294967168 }
  0x30   :  { %624 = dma.done.wait [#allocation6], 2560  }
  0x31   :  { %625 = vsyncadd [#allocation6], 4294964736 }
  0x32   :  { %626 = dma.done.wait [#allocation9], 2048  }
  0x33   :  { %627 = vsyncadd [#allocation9], 4294965248  ;;  %v636_v0 = vmov 0.0   ;;  %vm637_vm0 = vmmov 0   ;;  %v84_v1 = vld [vmem:[#allocation5 + $0x18] sm:$0xff]  ;;  %v83_v2 = vld [vmem:[#allocation5 + $0x10] sm:$0xff]  ;;  %v354_v48 = vlaneseq }
  0x34   :  { %428 = vmatprep.subr.mxu0 %v636_v0  ;;  %436 = vmatprep.mubr.msk.f32.mxu0 %vm637_vm0, %v636_v0  ;;  %v182_v3 = vld [vmem:[#allocation7 + $0x78] sm:$0xff]  ;;  %v82_v4 = vld [vmem:[#allocation5 + $0x8] sm:$0xff]  ;;  %v181_v5 = vld [vmem:[#allocation7 + $0x70] sm:$0xff]  ;;  %vm92_vm1 = vcmask 261120  }
  0x35   :  { %439 = vmatprep.subr.mxu1 %v636_v0  ;;  %471 = vmatprep.mubr.msk.f32.mxu1 %vm637_vm0, %v636_v0  ;;  %v180_v6 = vld [vmem:[#allocation7 + $0x68] sm:$0xff]  ;;  %v81_v7 = vld [vmem:[#allocation5] sm:$0xff]  ;;  %v80_v8 = vld [vmem:[#allocation2] sm:$0xff]  ;;  %v355_v49 = vand.u32 127, %v354_v48 }
  0x36   :  { %429 = vmatpush3.msra.mxu0 %v84_v1  ;;  %440 = vmatpush3.msra.mxu1 %v182_v3  ;;  %v179_v9 = vld [vmem:[#allocation7 + $0x60] sm:$0xff]  ;;  %v178_v10 = vld [vmem:[#allocation7 + $0x58] sm:$0xff]  ;;  %v177_v11 = vld [vmem:[#allocation7 + $0x50] sm:$0xff] }
  0x37   :  { %430 = vmatprep.subr.mxu0 %v636_v0  ;;  %441 = vmatprep.subr.mxu1 %v636_v0  ;;  %v176_v12 = vld [vmem:[#allocation7 + $0x48] sm:$0xff]  ;;  %v175_v13 = vld [vmem:[#allocation7 + $0x40] sm:$0xff]  ;;  %v174_v14 = vld [vmem:[#allocation7 + $0x38] sm:$0xff]  ;;  %vm356_vm2 = vcmp.lt.s32.totalorder %v355_v49, 16 }
  0x38   :  { %431 = vmatpush3.msra.mxu0 %v83_v2  ;;  %442 = vmatpush3.msra.mxu1 %v181_v5  ;;  %v173_v15 = vld [vmem:[#allocation7 + $0x30] sm:$0xff]  ;;  %v172_v16 = vld [vmem:[#allocation7 + $0x28] sm:$0xff]  ;;  %v171_v17 = vld [vmem:[#allocation7 + $0x20] sm:$0xff] }
  0x39   :  { %432 = vmatprep.subr.mxu0 %v636_v0  ;;  %443 = vmatprep.subr.mxu1 %v636_v0  ;;  %v170_v18 = vld [vmem:[#allocation7 + $0x18] sm:$0xff]  ;;  %v169_v19 = vld [vmem:[#allocation7 + $0x10] sm:$0xff]  ;;  %v168_v20 = vld [vmem:[#allocation7 + $0x8] sm:$0xff] }
  0x3a   :  { %433 = vmatpush3.msra.mxu0 %v82_v4  ;;  %444 = vmatpush3.msra.mxu1 %v180_v6  ;;  %v167_v21 = vld [vmem:[#allocation7] sm:$0xff]  ;;  %v276_v22 = vld [vmem:[#allocation8 + $0x78] sm:$0xff]  ;;  %v275_v23 = vld [vmem:[#allocation8 + $0x70] sm:$0xff] }
  0x3b   :  { %434 = vmatprep.subr.mxu0 %v636_v0  ;;  %445 = vmatprep.subr.mxu1 %v636_v0  ;;  %v274_v24 = vld [vmem:[#allocation8 + $0x68] sm:$0xff]  ;;  %v273_v25 = vld [vmem:[#allocation8 + $0x60] sm:$0xff]  ;;  %v272_v26 = vld [vmem:[#allocation8 + $0x58] sm:$0xff] }
  0x3c   :  { %435 = vmatpush3.msra.mxu0 %v81_v7  ;;  %446 = vmatpush3.msra.mxu1 %v179_v9  ;;  %v271_v27 = vld [vmem:[#allocation8 + $0x50] sm:$0xff]  ;;  %v270_v28 = vld [vmem:[#allocation8 + $0x48] sm:$0xff]  ;;  %v269_v29 = vld [vmem:[#allocation8 + $0x40] sm:$0xff] }
  0x3d   :  { %437 = vmatmul.mubr.msk.f32.vlgmr.msra.gmra.mxu0 %vm92_vm1, %v80_v8  ;;  %447 = vmatprep.subr.mxu1 %v636_v0  ;;  %v268_v30 = vld [vmem:[#allocation8 + $0x38] sm:$0xff]  ;;  %v267_v31 = vld [vmem:[#allocation8 + $0x30] sm:$0xff]  ;;  %v266_v32 = vld [vmem:[#allocation8 + $0x28] sm:$0xff] }
  0x3e   :  { %474 = vmatprep.subr.mxu0 %v636_v0  ;;  %448 = vmatpush3.msra.mxu1 %v178_v10  ;;  %v265_v33 = vld [vmem:[#allocation8 + $0x20] sm:$0xff]  ;;  %v264_v34 = vld [vmem:[#allocation8 + $0x18] sm:$0xff]  ;;  %v263_v40 = vld [vmem:[#allocation8 + $0x10] sm:$0xff] }
  0x3f   :  { %506 = vmatprep.mubr.msk.f32.mxu0 %vm637_vm0, %v636_v0  ;;  %449 = vmatprep.subr.mxu1 %v636_v0  ;;  %v385_v35 = vld [vmem:[%s756_s2] ss:$0 sm:$0xff]  ;;  %v262_v41 = vld [vmem:[#allocation8 + $0x8] sm:$0xff]  ;;  %v261_v42 = vld [vmem:[#allocation8] sm:$0xff] }
  0x40   :  { %450 = vmatpush3.msra.mxu1 %v177_v11  ;;  %475 = vmatpush3.msra.mxu0 %v276_v22  ;;  %v387_v43 = vld [vmem:[%s758_s4] ss:$0 sm:$0xff]  ;;  %s638_s4 = smov [#allocation10]  }
  0x41   :  { %451 = vmatprep.subr.mxu1 %v636_v0  ;;  %476 = vmatprep.subr.mxu0 %v636_v0  ;;  %v388_v50 = vld [vmem:[%s760_s6] ss:$0 sm:$0xff]  ;;  %s374_s24 = sshll.u32 %s638_s4, 4  ;;  %s375_s24 = int_to_ptr.vmem [resolvable:$true] %s374_s24 }
  0x42   :  { %452 = vmatpush3.msra.mxu1 %v176_v12  ;;  %477 = vmatpush3.msra.mxu0 %v275_v23  ;;  %s602_s6 = scalar_lea.vmem %s375_s24, 128  ;;  %p607_p7 = scmp.lt.s32.totalorder %s375_s24, %s375_s24 }
  0x43   :  { %453 = vmatprep.subr.mxu1 %v636_v0  ;;  %478 = vmatprep.subr.mxu0 %v636_v0  ;;  %p603_p6 = scmp.ne.s32.totalorder %s375_s24, %s602_s6  ;;  %p608_p8 = scmp.lt.s32.totalorder %s602_s6, %s602_s6 }
  0x44   :  { %454 = vmatpush3.msra.mxu1 %v175_v13  ;;  %479 = vmatpush3.msra.mxu0 %v274_v24 }
  0x45   :  { %455 = vmatprep.subr.mxu1 %v636_v0  ;;  %480 = vmatprep.subr.mxu0 %v636_v0  ;;  %p609_p9 = por %p608_p8, %p607_p7 }
  0x46   :  { %456 = vmatpush3.msra.mxu1 %v174_v14  ;;  %481 = vmatpush3.msra.mxu0 %v273_v25 }
  0x47   :  { %457 = vmatprep.subr.mxu1 %v636_v0  ;;  %482 = vmatprep.subr.mxu0 %v636_v0  ;;  %p610_p10 = pnand %p609_p9, %p603_p6 }
  0x48   :  { %458 = vmatpush3.msra.mxu1 %v173_v15  ;;  %483 = vmatpush3.msra.mxu0 %v272_v26 }
  0x49   :  { %459 = vmatprep.subr.mxu1 %v636_v0  ;;  %484 = vmatprep.subr.mxu0 %v636_v0 }
  0x4a   :  { %460 = vmatpush3.msra.mxu1 %v172_v16  ;;  %485 = vmatpush3.msra.mxu0 %v271_v27 }
  0x4b   :  { %461 = vmatprep.subr.mxu1 %v636_v0  ;;  %486 = vmatprep.subr.mxu0 %v636_v0 }
  0x4c   :  { %462 = vmatpush3.msra.mxu1 %v171_v17  ;;  %487 = vmatpush3.msra.mxu0 %v270_v28 }
  0x4d   :  { %463 = vmatprep.subr.mxu1 %v636_v0  ;;  %488 = vmatprep.subr.mxu0 %v636_v0 }
  0x4e   :  { %464 = vmatpush3.msra.mxu1 %v170_v18  ;;  %489 = vmatpush3.msra.mxu0 %v269_v29 }
  0x4f   :  { %465 = vmatprep.subr.mxu1 %v636_v0  ;;  %490 = vmatprep.subr.mxu0 %v636_v0 }
  0x50   :  { %466 = vmatpush3.msra.mxu1 %v169_v19  ;;  %491 = vmatpush3.msra.mxu0 %v268_v30 }
  0x51   :  { %467 = vmatprep.subr.mxu1 %v636_v0  ;;  %492 = vmatprep.subr.mxu0 %v636_v0 }
  0x52   :  { %468 = vmatpush3.msra.mxu1 %v168_v20  ;;  %493 = vmatpush3.msra.mxu0 %v267_v31 }
  0x53   :  { %469 = vmatprep.subr.mxu1 %v636_v0  ;;  %494 = vmatprep.subr.mxu0 %v636_v0 }
  0x54   :  { %470 = vmatpush3.msra.mxu1 %v167_v21  ;;  %495 = vmatpush3.msra.mxu0 %v266_v32 }
  0x55   :  { %496 = vmatprep.subr.mxu0 %v636_v0 }
  0x56   :  { %497 = vmatpush3.msra.mxu0 %v265_v33 }
  0x57   :  { %498 = vmatprep.subr.mxu0 %v636_v0 }
  0x58   :  { %499 = vmatpush3.msra.mxu0 %v264_v34 }
  0x59   :  { %500 = vmatprep.subr.mxu0 %v636_v0 }
  0x5a   :  { %501 = vmatpush3.msra.mxu0 %v263_v40 }
  0x5b   :  { %502 = vmatprep.subr.mxu0 %v636_v0 }
  0x5c   :  { %503 = vmatpush3.msra.mxu0 %v262_v41 }
  0x5d   :  { %504 = vmatprep.subr.mxu0 %v636_v0 }
  0x5e   :  { %505 = vmatpush3.msra.mxu0 %v261_v42 }
  0xfd   :  { %v162_v36 = vpop.f32.mrf.mxu0 }
  0xfe   :  { %v163_v37 = vadd.f32 %v385_v35, %v162_v36 }
  0xff   :  { %v438_v38 = vpop.f32.mrf.mxu0 }
 0x100   :  { %v166_v39 = vmax.f32 %v163_v37, 0.0 }
 0x102   :  { %472 = vmatmul.mubr.f32.vlgmr.msra.gmra.mxu1 %v166_v39 }
 0x1c2   :  { %v256_v44 = vpop.f32.mrf.mxu1 }
 0x1c3   :  { %v257_v45 = vadd.f32 %v387_v43, %v256_v44 }
 0x1c4   :  { %v473_v46 = vpop.f32.mrf.mxu1 }
 0x1c5   :  { %v260_v47 = vmax.f32 %v257_v45, 0.0 }
 0x1c7   :  { %507 = vmatmul.mubr.f32.vlgmr.msra.gmra.mxu0 %v260_v47 }
 0x287   :  { %v350_v51 = vpop.f32.mrf.mxu0 }
 0x288   :  { %v351_v52 = vadd.f32 %v388_v50, %v350_v51 }
 0x289   :  { %v508_v53 = vpop.f32.mrf.mxu0 }
 0x28a   :  { %v357_v54 = vsel %vm356_vm2, %v351_v52, -1e+30 }
 0x28b   :  { %358 = vmax.xlane.f32.xlu0 %v357_v54 }
 0x314   :  { %v359_v55 = vpop.xlane.xlu0 %358 }
 0x315   :  { %v360_v56 = vsub.f32 %v357_v54, %v359_v55 }
 0x317   :  { %v361_v57 = vmul.f32 1.442695, %v360_v56 }
 0x319   :  { %518 = vpow2.f32 %v361_v57 }
 0x326   :  { %v519_v58 = vpop.eup %518 }
 0x327   :  { %363 = vadd.xlane.f32.xlu0 %v519_v58 }
 0x3b0   :  { %v364_v59 = vpop.xlane.xlu0 %363 }
 0x3b1   :  { %520 = vrcp.f32 %v364_v59 }
 0x3be   :  { %v521_v60 = vpop.eup %520 }
 0x3bf   :  { %v366_v61 = vmul.f32 %v521_v60, %v519_v58 }
 0x3c1   :  { %367 = vst [vmem:[#allocation10] sm:$0xff] %v366_v61 }
 0x3c2   :  { %613 = shalt.err (!%p610_p10)
}
 0x3c3   :  { %377 = dma.vmem_to_hbm [thread:$0]  %s375_s24, 128, %s761_s7, [#allocation4]  }
 0x3c4   :  { %628 = dma.done.wait [#allocation4], 128  }
 0x3c5   :  { %629 = vsyncadd [#allocation4], 4294967168 }
 0x3c6   :  { %381 = vsyncpa [#allocation3], 1 }
 0x3c7   :  { %382 = vsyncpa [#allocation6], 1 }
 0x3c8   :  { %383 = vsyncpa [#allocation9], 1 }
 0x3c9   :  { %384 = vsyncpa [#allocation4], 1 }

// kernel: tpu_custom_call.1
= control target key start
LH: loop header
LB: loop body
LE: loop exit
PB: predicated region body
PF: predicated region fallthrough
CT: control target
= control target key end

     0   :  { %12 = vsyncpa [#allocation3], 0  ;;  %s754_s0 = inlined_call_operand.hbm [shape: f32[8,32], index: 0, kind: input, shape index: {}]   ;;  %s755_s1 = inlined_call_operand.hbm [shape: f32[32,128], index: 1, kind: input, shape index: {}]   ;;  %s756_s2 = inlined_call_operand.vmem [shape: f32[1,128], index: 2, kind: input, shape index: {}]   ;;  %s757_s3 = inlined_call_operand.hbm [shape: f32[128,128], index: 3, kind: input, shape index: {}]   ;;  %s758_s4 = inlined_call_operand.vmem [shape: f32[1,128], index: 4, kind: input, shape index: {}]   ;;  %s759_s5 = inlined_call_operand.hbm [shape: f32[128,128], index: 5, kind: input, shape index: {}]   ;;  %s760_s6 = inlined_call_operand.vmem [shape: f32[1,128], index: 6, kind: input, shape index: {}]   ;;  %s761_s7 = inlined_call_operand.hbm [shape: f32[8,128], index: 7, kind: output, shape index: {}]  }
   0x1   :  { %13 = vsyncpa [#allocation6], 0 }
   0x2   :  { %14 = vsyncpa [#allocation9], 0 }
   0x3   :  { %15 = vsyncpa [#allocation4], 0  ;;  %s630_s24 = smov [#allocation5]  }
   0x4   :  { %s31_s25 = sshll.u32 %s630_s24, 4  ;;  %s32_s25 = int_to_ptr.vmem [resolvable:$true] %s31_s25 }
   0x5   :  { %s530_s26 = scalar_lea.vmem %s32_s25, 512  ;;  %p535_p1 = scmp.lt.s32.totalorder %s32_s25, %s32_s25 }
   0x6   :  { %p531_p0 = scmp.ne.s32.totalorder %s32_s25, %s530_s26  ;;  %p536_p2 = scmp.lt.s32.totalorder %s530_s26, %s530_s26 }
   0x8   :  { %p537_p3 = por %p536_p2, %p535_p1 }
   0xa   :  { %p538_p4 = pnand %p537_p3, %p531_p0 }
   0xc   :  { %541 = shalt.err (!%p538_p4)
}
   0xd   :  { %s631_s27 = smov 128   ;;  %s632_s28 = smov 8  }
   0xe   :  { %37 = dma.hbm_to_vmem [thread:$0]  %s755_s1, 512, %s32_s25, [#allocation6], %s631_s27, %s631_s27, %s632_s28  }
   0xf   :  { %s633_s8 = smov [#allocation2]   ;;  %s634_s10 = smov [#allocation7]  }
  0x10   :  { %s22_s9 = sshll.u32 %s633_s8, 4  ;;  %s45_s11 = sshll.u32 %s634_s10, 4  ;;  %s23_s9 = int_to_ptr.vmem [resolvable:$true] %s22_s9  ;;  %s46_s11 = int_to_ptr.vmem [resolvable:$true] %s45_s11 }
  0x11   :  { %s550_s12 = scalar_lea.vmem %s23_s9, 128  ;;  %p555_p6 = scmp.lt.s32.totalorder %s23_s9, %s23_s9 }
  0x12   :  { %p551_p5 = scmp.ne.s32.totalorder %s23_s9, %s550_s12  ;;  %p556_p7 = scmp.lt.s32.totalorder %s550_s12, %s550_s12 }
  0x14   :  { %p557_p8 = por %p556_p7, %p555_p6 }
  0x16   :  { %p558_p9 = pnand %p557_p8, %p551_p5 }
  0x18   :  { %561 = shalt.err (!%p558_p9)
}
  0x19   :  { %25 = dma.hbm_to_vmem [thread:$0]  %s754_s0, 128, %s23_s9, [#allocation3]  }
  0x1a   :  { %s570_s15 = scalar_lea.vmem %s46_s11, 2048  ;;  %p575_p11 = scmp.lt.s32.totalorder %s46_s11, %s46_s11 }
  0x1b   :  { %p571_p10 = scmp.ne.s32.totalorder %s46_s11, %s570_s15  ;;  %p576_p12 = scmp.lt.s32.totalorder %s570_s15, %s570_s15 }
  0x1d   :  { %p577_p13 = por %p576_p12, %p575_p11 }
  0x1f   :  { %p578_p0 = pnand %p577_p13, %p571_p10 }
  0x21   :  { %581 = shalt.err (!%p578_p0)
}
  0x22   :  { %51 = dma.hbm_to_vmem [thread:$0]  %s757_s3, 2048, %s46_s11, [#allocation6], %s631_s27, %s631_s27, %s632_s28  }
  0x23   :  { %s635_s17 = smov [#allocation8]  }
  0x24   :  { %s59_s18 = sshll.u32 %s635_s17, 4  ;;  %s60_s18 = int_to_ptr.vmem [resolvable:$true] %s59_s18 }
  0x25   :  { %s590_s19 = scalar_lea.vmem %s60_s18, 2048  ;;  %p595_p2 = scmp.lt.s32.totalorder %s60_s18, %s60_s18 }
  0x26   :  { %p591_p1 = scmp.ne.s32.totalorder %s60_s18, %s590_s19  ;;  %p596_p3 = scmp.lt.s32.totalorder %s590_s19, %s590_s19 }
  0x28   :  { %p597_p4 = por %p596_p3, %p595_p2 }
  0x2a   :  { %p598_p5 = pnand %p597_p4, %p591_p1 }
  0x2c   :  { %601 = shalt.err (!%p598_p5)
}
  0x2d   :  { %65 = dma.hbm_to_vmem [thread:$0]  %s759_s5, 2048, %s60_s18, [#allocation9], %s631_s27, %s631_s27, %s632_s28  }
  0x2e   :  { %622 = dma.done.wait [#allocation3], 128  }
  0x2f   :  { %623 = vsyncadd [#allocation3], 4294967168 }
  0x30   :  { %624 = dma.done.wait [#allocation6], 2560  }
  0x31   :  { %625 = vsyncadd [#allocation6], 4294964736 }
  0x32   :  { %626 = dma.done.wait [#allocation9], 2048  }
  0x33   :  { %627 = vsyncadd [#allocation9], 4294965248  ;;  %v636_v0 = vmov 0.0   ;;  %vm637_vm0 = vmmov 0   ;;  %v84_v1 = vld [vmem:[#allocation5 + $0x18] sm:$0xff]  ;;  %v83_v2 = vld [vmem:[#allocation5 + $0x10] sm:$0xff]  ;;  %v354_v48 = vlaneseq }
  0x34   :  { %428 = vmatprep.subr.mxu0 %v636_v0  ;;  %436 = vmatprep.mubr.msk.f32.mxu0 %vm637_vm0, %v636_v0  ;;  %v182_v3 = vld [vmem:[#allocation7 + $0x78] sm:$0xff]  ;;  %v82_v4 = vld [vmem:[#allocation5 + $0x8] sm:$0xff]  ;;  %v181_v5 = vld [vmem:[#allocation7 + $0x70] sm:$0xff]  ;;  %vm92_vm1 = vcmask 261120  }
  0x35   :  { %439 = vmatprep.subr.mxu1 %v636_v0  ;;  %471 = vmatprep.mubr.msk.f32.mxu1 %vm637_vm0, %v636_v0  ;;  %v180_v6 = vld [vmem:[#allocation7 + $0x68] sm:$0xff]  ;;  %v81_v7 = vld [vmem:[#allocation5] sm:$0xff]  ;;  %v80_v8 = vld [vmem:[#allocation2] sm:$0xff]  ;;  %v355_v49 = vand.u32 127, %v354_v48 }
  0x36   :  { %429 = vmatpush3.msra.mxu0 %v84_v1  ;;  %440 = vmatpush3.msra.mxu1 %v182_v3  ;;  %v179_v9 = vld [vmem:[#allocation7 + $0x60] sm:$0xff]  ;;  %v178_v10 = vld [vmem:[#allocation7 + $0x58] sm:$0xff]  ;;  %v177_v11 = vld [vmem:[#allocation7 + $0x50] sm:$0xff] }
  0x37   :  { %430 = vmatprep.subr.mxu0 %v636_v0  ;;  %441 = vmatprep.subr.mxu1 %v636_v0  ;;  %v176_v12 = vld [vmem:[#allocation7 + $0x48] sm:$0xff]  ;;  %v175_v13 = vld [vmem:[#allocation7 + $0x40] sm:$0xff]  ;;  %v174_v14 = vld [vmem:[#allocation7 + $0x38] sm:$0xff]  ;;  %vm356_vm2 = vcmp.lt.s32.totalorder %v355_v49, 16 }
  0x38   :  { %431 = vmatpush3.msra.mxu0 %v83_v2  ;;  %442 = vmatpush3.msra.mxu1 %v181_v5  ;;  %v173_v15 = vld [vmem:[#allocation7 + $0x30] sm:$0xff]  ;;  %v172_v16 = vld [vmem:[#allocation7 + $0x28] sm:$0xff]  ;;  %v171_v17 = vld [vmem:[#allocation7 + $0x20] sm:$0xff] }
  0x39   :  { %432 = vmatprep.subr.mxu0 %v636_v0  ;;  %443 = vmatprep.subr.mxu1 %v636_v0  ;;  %v170_v18 = vld [vmem:[#allocation7 + $0x18] sm:$0xff]  ;;  %v169_v19 = vld [vmem:[#allocation7 + $0x10] sm:$0xff]  ;;  %v168_v20 = vld [vmem:[#allocation7 + $0x8] sm:$0xff] }
  0x3a   :  { %433 = vmatpush3.msra.mxu0 %v82_v4  ;;  %444 = vmatpush3.msra.mxu1 %v180_v6  ;;  %v167_v21 = vld [vmem:[#allocation7] sm:$0xff]  ;;  %v276_v22 = vld [vmem:[#allocation8 + $0x78] sm:$0xff]  ;;  %v275_v23 = vld [vmem:[#allocation8 + $0x70] sm:$0xff] }
  0x3b   :  { %434 = vmatprep.subr.mxu0 %v636_v0  ;;  %445 = vmatprep.subr.mxu1 %v636_v0  ;;  %v274_v24 = vld [vmem:[#allocation8 + $0x68] sm:$0xff]  ;;  %v273_v25 = vld [vmem:[#allocation8 + $0x60] sm:$0xff]  ;;  %v272_v26 = vld [vmem:[#allocation8 + $0x58] sm:$0xff] }
  0x3c   :  { %435 = vmatpush3.msra.mxu0 %v81_v7  ;;  %446 = vmatpush3.msra.mxu1 %v179_v9  ;;  %v271_v27 = vld [vmem:[#allocation8 + $0x50] sm:$0xff]  ;;  %v270_v28 = vld [vmem:[#allocation8 + $0x48] sm:$0xff]  ;;  %v269_v29 = vld [vmem:[#allocation8 + $0x40] sm:$0xff] }
  0x3d   :  { %437 = vmatmul.mubr.msk.f32.vlgmr.msra.gmra.mxu0 %vm92_vm1, %v80_v8  ;;  %447 = vmatprep.subr.mxu1 %v636_v0  ;;  %v268_v30 = vld [vmem:[#allocation8 + $0x38] sm:$0xff]  ;;  %v267_v31 = vld [vmem:[#allocation8 + $0x30] sm:$0xff]  ;;  %v266_v32 = vld [vmem:[#allocation8 + $0x28] sm:$0xff] }
  0x3e   :  { %474 = vmatprep.subr.mxu0 %v636_v0  ;;  %448 = vmatpush3.msra.mxu1 %v178_v10  ;;  %v265_v33 = vld [vmem:[#allocation8 + $0x20] sm:$0xff]  ;;  %v264_v34 = vld [vmem:[#allocation8 + $0x18] sm:$0xff]  ;;  %v263_v40 = vld [vmem:[#allocation8 + $0x10] sm:$0xff] }
  0x3f   :  { %506 = vmatprep.mubr.msk.f32.mxu0 %vm637_vm0, %v636_v0  ;;  %449 = vmatprep.subr.mxu1 %v636_v0  ;;  %v385_v35 = vld [vmem:[%s756_s2] ss:$0 sm:$0xff]  ;;  %v262_v41 = vld [vmem:[#allocation8 + $0x8] sm:$0xff]  ;;  %v261_v42 = vld [vmem:[#allocation8] sm:$0xff] }
  0x40   :  { %450 = vmatpush3.msra.mxu1 %v177_v11  ;;  %475 = vmatpush3.msra.mxu0 %v276_v22  ;;  %v387_v43 = vld [vmem:[%s758_s4] ss:$0 sm:$0xff]  ;;  %s638_s4 = smov [#allocation10]  }
  0x41   :  { %451 = vmatprep.subr.mxu1 %v636_v0  ;;  %476 = vmatprep.subr.mxu0 %v636_v0  ;;  %v388_v50 = vld [vmem:[%s760_s6] ss:$0 sm:$0xff]  ;;  %s374_s24 = sshll.u32 %s638_s4, 4  ;;  %s375_s24 = int_to_ptr.vmem [resolvable:$true] %s374_s24 }
  0x42   :  { %452 = vmatpush3.msra.mxu1 %v176_v12  ;;  %477 = vmatpush3.msra.mxu0 %v275_v23  ;;  %s602_s6 = scalar_lea.vmem %s375_s24, 128  ;;  %p607_p7 = scmp.lt.s32.totalorder %s375_s24, %s375_s24 }
  0x43   :  { %453 = vmatprep.subr.mxu1 %v636_v0  ;;  %478 = vmatprep.subr.mxu0 %v636_v0  ;;  %p603_p6 = scmp.ne.s32.totalorder %s375_s24, %s602_s6  ;;  %p608_p8 = scmp.lt.s32.totalorder %s602_s6, %s602_s6 }
  0x44   :  { %454 = vmatpush3.msra.mxu1 %v175_v13  ;;  %479 = vmatpush3.msra.mxu0 %v274_v24 }
  0x45   :  { %455 = vmatprep.subr.mxu1 %v636_v0  ;;  %480 = vmatprep.subr.mxu0 %v636_v0  ;;  %p609_p9 = por %p608_p8, %p607_p7 }
  0x46   :  { %456 = vmatpush3.msra.mxu1 %v174_v14  ;;  %481 = vmatpush3.msra.mxu0 %v273_v25 }
  0x47   :  { %457 = vmatprep.subr.mxu1 %v636_v0  ;;  %482 = vmatprep.subr.mxu0 %v636_v0  ;;  %p610_p10 = pnand %p609_p9, %p603_p6 }
  0x48   :  { %458 = vmatpush3.msra.mxu1 %v173_v15  ;;  %483 = vmatpush3.msra.mxu0 %v272_v26 }
  0x49   :  { %459 = vmatprep.subr.mxu1 %v636_v0  ;;  %484 = vmatprep.subr.mxu0 %v636_v0 }
  0x4a   :  { %460 = vmatpush3.msra.mxu1 %v172_v16  ;;  %485 = vmatpush3.msra.mxu0 %v271_v27 }
  0x4b   :  { %461 = vmatprep.subr.mxu1 %v636_v0  ;;  %486 = vmatprep.subr.mxu0 %v636_v0 }
  0x4c   :  { %462 = vmatpush3.msra.mxu1 %v171_v17  ;;  %487 = vmatpush3.msra.mxu0 %v270_v28 }
  0x4d   :  { %463 = vmatprep.subr.mxu1 %v636_v0  ;;  %488 = vmatprep.subr.mxu0 %v636_v0 }
  0x4e   :  { %464 = vmatpush3.msra.mxu1 %v170_v18  ;;  %489 = vmatpush3.msra.mxu0 %v269_v29 }
  0x4f   :  { %465 = vmatprep.subr.mxu1 %v636_v0  ;;  %490 = vmatprep.subr.mxu0 %v636_v0 }
  0x50   :  { %466 = vmatpush3.msra.mxu1 %v169_v19  ;;  %491 = vmatpush3.msra.mxu0 %v268_v30 }
  0x51   :  { %467 = vmatprep.subr.mxu1 %v636_v0  ;;  %492 = vmatprep.subr.mxu0 %v636_v0 }
  0x52   :  { %468 = vmatpush3.msra.mxu1 %v168_v20  ;;  %493 = vmatpush3.msra.mxu0 %v267_v31 }
  0x53   :  { %469 = vmatprep.subr.mxu1 %v636_v0  ;;  %494 = vmatprep.subr.mxu0 %v636_v0 }
  0x54   :  { %470 = vmatpush3.msra.mxu1 %v167_v21  ;;  %495 = vmatpush3.msra.mxu0 %v266_v32 }
  0x55   :  { %496 = vmatprep.subr.mxu0 %v636_v0 }
  0x56   :  { %497 = vmatpush3.msra.mxu0 %v265_v33 }
  0x57   :  { %498 = vmatprep.subr.mxu0 %v636_v0 }
  0x58   :  { %499 = vmatpush3.msra.mxu0 %v264_v34 }
  0x59   :  { %500 = vmatprep.subr.mxu0 %v636_v0 }
  0x5a   :  { %501 = vmatpush3.msra.mxu0 %v263_v40 }
  0x5b   :  { %502 = vmatprep.subr.mxu0 %v636_v0 }
  0x5c   :  { %503 = vmatpush3.msra.mxu0 %v262_v41 }
  0x5d   :  { %504 = vmatprep.subr.mxu0 %v636_v0 }
  0x5e   :  { %505 = vmatpush3.msra.mxu0 %v261_v42 }
  0xfd   :  { %v162_v36 = vpop.f32.mrf.mxu0 }
  0xfe   :  { %v163_v37 = vadd.f32 %v385_v35, %v162_v36 }
  0xff   :  { %v438_v38 = vpop.f32.mrf.mxu0 }
 0x100   :  { %v166_v39 = vmax.f32 %v163_v37, 0.0 }
 0x102   :  { %472 = vmatmul.mubr.f32.vlgmr.msra.gmra.mxu1 %v166_v39 }
 0x1c2   :  { %v256_v44 = vpop.f32.mrf.mxu1 }
 0x1c3   :  { %v257_v45 = vadd.f32 %v387_v43, %v256_v44 }
 0x1c4   :  { %v473_v46 = vpop.f32.mrf.mxu1 }
 0x1c5   :  { %v260_v47 = vmax.f32 %v257_v45, 0.0 }
 0x1c7   :  { %507 = vmatmul.mubr.f32.vlgmr.msra.gmra.mxu0 %v260_v47 }
 0x287   :  { %v350_v51 = vpop.f32.mrf.mxu0 }
 0x288   :  { %v351_v52 = vadd.f32 %v388_v50, %v350_v51 }
 0x289   :  { %v508_v53 = vpop.f32.mrf.mxu0 }
 0x28a   :  { %v357_v54 = vsel %vm356_vm2, %v351_v52, -1e+30 }
 0x28b   :  { %358 = vmax.xlane.f32.xlu0 %v357_v54 }
 0x314   :  { %v359_v55 = vpop.xlane.xlu0 %358 }
 0x315   :  { %v360_v56 = vsub.f32 %v357_v54, %v359_v55 }
 0x317   :  { %v361_v57 = vmul.f32 1.442695, %v360_v56 }
 0x319   :  { %518 = vpow2.f32 %v361_v57 }
 0x326   :  { %v519_v58 = vpop.eup %518 }
 0x327   :  { %363 = vadd.xlane.f32.xlu0 %v519_v58 }
 0x3b0   :  { %v364_v59 = vpop.xlane.xlu0 %363 }
 0x3b1   :  { %520 = vrcp.f32 %v364_v59 }
 0x3be   :  { %v521_v60 = vpop.eup %520 }
 0x3bf   :  { %v366_v61 = vmul.f32 %v521_v60, %v519_v58 }
 0x3c1   :  { %367 = vst [vmem:[#allocation10] sm:$0xff] %v366_v61 }
 0x3c2   :  { %613 = shalt.err (!%p610_p10)
}
 0x3c3   :  { %377 = dma.vmem_to_hbm [thread:$0]  %s375_s24, 128, %s761_s7, [#allocation4]  }
 0x3c4   :  { %628 = dma.done.wait [#allocation4], 128  }
 0x3c5   :  { %629 = vsyncadd [#allocation4], 4294967168 }
 0x3c6   :  { %381 = vsyncpa [#allocation3], 1 }
 0x3c7   :  { %382 = vsyncpa [#allocation6], 1 }
 0x3c8   :  { %383 = vsyncpa [#allocation9], 1 }
 0x3c9   :  { %384 = vsyncpa [#allocation4], 1 }

</bundles_post_ra>
